<compile_context>
chip_gen: v7x
topology: tpu7x:2x2x1
jax: 0.10.0
libtpu: 0.0.40
codegen_flags: <defaults>
</compile_context>

<pallas_src>
import functools

import jax
import jax.numpy as jnp
from jax.experimental import pallas as pl
from jax.experimental.pallas import tpu as pltpu

LN_EPS = 1e-5  # torch.nn.LayerNorm default


# ----------------------------- kernel bodies ---------------------------------

def _layernorm_f32(x, gamma, beta):
    """Row-wise LayerNorm in f32, two-pass variance (matches torch numerics)."""
    mean = jnp.mean(x, axis=-1, keepdims=True)
    xc = x - mean
    var = jnp.mean(xc * xc, axis=-1, keepdims=True)
    inv = jax.lax.rsqrt(var + LN_EPS)
    return xc * inv * gamma + beta


def _ln_linear_kernel(x_ref, gamma_ref, beta_ref, wt_ref, b_ref, o_ref):
    """Fused LN + Linear on one tile (used when LN hoisting is unnecessary).

    x_ref:  (TM, D)   input rows
    wt_ref: (D, TN)   weight, pre-transposed (in, out), bf16 -> natural MXU RHS
    b_ref:  (1, TN)   bias slice
    o_ref:  (TM, TN)  output tile
    """
    x = x_ref[...].astype(jnp.float32)
    normed = _layernorm_f32(x, gamma_ref[...].astype(jnp.float32),
                            beta_ref[...].astype(jnp.float32))
    y = jnp.dot(normed.astype(jnp.bfloat16), wt_ref[...],
                preferred_element_type=jnp.float32)
    o_ref[...] = (y + b_ref[...].astype(jnp.float32)).astype(o_ref.dtype)


def _ln_linear_hoisted_kernel(x_ref, gamma_ref, beta_ref, wt_ref, b_ref, o_ref,
                              normed_ref):
    """Column-tiled variant: LN computed once per row tile (j == 0) into a bf16
    VMEM scratch; every column step is pure MXU matmul + bias."""
    @pl.when(pl.program_id(1) == 0)
    def _():
        x = x_ref[...].astype(jnp.float32)
        normed_ref[...] = _layernorm_f32(
            x, gamma_ref[...].astype(jnp.float32),
            beta_ref[...].astype(jnp.float32)).astype(jnp.bfloat16)

    y = jnp.dot(normed_ref[...], wt_ref[...], preferred_element_type=jnp.float32)
    o_ref[...] = (y + b_ref[...].astype(jnp.float32)).astype(o_ref.dtype)


# ----------------------------- tiling planner --------------------------------

def _ru8(n):
    return ((n + 7) // 8) * 8


def _usable_vmem_bytes():
    """Per-core VMEM budget with headroom for Mosaic internal scratch."""
    cap = 64 << 20  # conservative default (v7x per-core VMEM)
    try:
        cap = int(pltpu.get_tpu_info().vmem_capacity_bytes)
    except Exception:
        pass
    # ~51 MiB on a 64 MiB part (v7x), ~102 MiB on 128 MiB parts (v5e/v6e).
    return max(32 << 20, int(cap * 0.8))


def _vmem_need_bytes(block_rows, block_cols, d_in, x_item, out_item, hoisted):
    x_buf = 2 * block_rows * d_in * x_item               # double-buffered input
    o_buf = 2 * block_rows * block_cols * out_item       # double-buffered output
    w_buf = 2 * d_in * block_cols * 2                    # bf16 weight block(s)
    params = 2 * (2 * d_in * 4 + block_cols * 4)         # gamma / beta / bias
    scratch = block_rows * d_in * 2 if hoisted else 0    # hoisted bf16 normed
    temps = 6 * block_rows * max(d_in, block_cols) * 4   # in-kernel f32 temps
    return x_buf + o_buf + w_buf + params + scratch + temps


def _pick_block_rows(rows, d_in, x_item):
    """Row tile: ~2 MiB of input per block (memory-bound => big tiles), D-aware,
    multiple of 8, and an even tile count so v7x's two TCs stay balanced."""
    if rows <= 16:
        return rows
    target = max(64, (2 << 20) // max(1, d_in * x_item))
    bm = min(rows, target, 1024)
    bm = max(8, (bm // 8) * 8)
    n = pl.cdiv(rows, bm)
    if n == 1:
        bm = min(bm, _ru8(pl.cdiv(rows, 2)))      # at least 2 row tiles
    elif n % 2 == 1:
        bm = min(bm, _ru8(pl.cdiv(rows, n + 1)))  # make the tile count even
    return max(8, bm)


def _plan_tiling(rows, d_in, d_out, x_item, out_item, usable):
    """Returns (block_rows, block_cols, layout) with layout in
    {"row_outer", "col_outer"}."""
    block_rows = _pick_block_rows(rows, d_in, x_item)

    # 1) Prefer the whole pre-transposed bf16 weight resident in VMEM:
    #    it is then DMA'd from HBM exactly once for the whole call.
    br = block_rows
    while True:
        if _vmem_need_bytes(br, d_out, d_in, x_item, out_item, False) <= usable:
            return br, d_out, "row_outer"
        nbr = max(8, ((br // 2) // 8) * 8)
        if nbr < 64 or nbr >= br:       # don't starve the MXU for residency
            break
        br = nbr

    # 2) Column-tile the weight / output (lane-dense multiples of 128).
    block_cols = min(512, d_out) if d_out % 128 == 0 else d_out
    while _vmem_need_bytes(block_rows, block_cols, d_in, x_item, out_item,
                           True) > usable:
        if block_rows > 64:
            block_rows = max(64, ((block_rows // 2) // 8) * 8)
        elif block_cols > 128 and block_cols % 128 == 0:
            block_cols = max(128, block_cols // 2)
        else:
            break

    # 3) Re-stream the cheaper operand from HBM:
    #    row_outer  -> weight slices re-fetched once per row tile (x resident)
    #    col_outer  -> x re-fetched once per column tile (weight slice resident)
    row_tiles = pl.cdiv(rows, block_rows)
    col_tiles = pl.cdiv(d_out, block_cols)
    weight_restream = row_tiles * d_out * d_in * 2
    x_restream = col_tiles * rows * d_in * x_item
    layout = "row_outer" if weight_restream <= x_restream else "col_outer"
    return block_rows, block_cols, layout


# ----------------------------- public entry points ----------------------------

def prepare_linear_weight(w):
    """One-time (init-time) weight prep: torch (out, in) -> (in, out), bf16.

    Done OUTSIDE the jitted forward so the transpose + cast never re-run per
    call, and so the kernel's MXU contraction sees the weight in its natural
    (K, N) layout -- no per-step XLU transpose inside the kernel.
    """
    return jnp.asarray(w).T.astype(jnp.bfloat16)


@functools.partial(
    jax.jit,
    static_argnames=("chunks", "along_dim", "block_rows", "block_cols", "layout"))
def chunk_forward(x, gamma, beta, w_t, b, *, chunks=1, along_dim=1,
                  block_rows=None, block_cols=None, layout=None):
    """Chunk(chunks, fn=LayerNorm(D)+Linear(D, D_out), along_dim).forward(x).

    x: (B, S, D).  gamma/beta: (D,).  w_t: (D, D_out) pre-transposed bf16
    (see prepare_linear_weight).  b: (D_out,).  Output dtype follows x (so bf16
    activations halve HBM traffic if desired).
    """
    B, S, D = x.shape
    ad = along_dim % x.ndim
    if ad == x.ndim - 1:
        # TODO(synk): chunking along the normalized feature axis changes the
        # width fn sees (D/chunks features) -- a different computation; not mapped.
        raise NotImplementedError("along_dim on the feature axis not supported")
    if chunks > 1 and x.shape[ad] % chunks != 0:
        raise NotImplementedError("uneven torch.chunk pieces not supported")

    # fn acts independently on each (batch, seq) row, so chunk/apply/concat
    # along a non-feature axis equals one fused pass over all rows.
    rows = B * S
    d_out = w_t.shape[1]
    x2 = x.reshape(rows, D)
    x_item = x2.dtype.itemsize
    out_dtype = x.dtype
    out_item = jnp.dtype(out_dtype).itemsize

    gamma2 = gamma.reshape(1, D).astype(jnp.float32)
    beta2 = beta.reshape(1, D).astype(jnp.float32)
    b2 = b.reshape(1, d_out).astype(jnp.float32)
    w_t = w_t.astype(jnp.bfloat16)  # no-op when prepared via prepare_linear_weight

    usable = _usable_vmem_bytes()
    p_rows, p_cols, p_layout = _plan_tiling(rows, D, d_out, x_item, out_item,
                                            usable)
    block_rows = min(block_rows or p_rows, rows)
    block_cols = min(block_cols or p_cols, d_out)
    layout = layout or p_layout

    row_tiles = pl.cdiv(rows, block_rows)
    col_tiles = pl.cdiv(d_out, block_cols)
    hoisted = (layout == "row_outer") and (col_tiles > 1)

    if layout == "row_outer":
        # Rows outer (megacore-parallel), columns inner; x block resident across
        # the column loop and the LN hoisted to j == 0 when column-tiled.
        grid = (row_tiles, col_tiles)
        x_spec = pl.BlockSpec((block_rows, D), lambda i, j: (i, 0))
        w_spec = pl.BlockSpec((D, block_cols), lambda i, j: (0, j))
        b_spec = pl.BlockSpec((1, block_cols), lambda i, j: (0, j))
        p_spec = pl.BlockSpec((1, D), lambda i, j: (0, 0))
        o_spec = pl.BlockSpec((block_rows, block_cols), lambda i, j: (i, j))
        weight_bytes = (row_tiles if col_tiles > 1 else 1) * d_out * D * 2
        x_bytes = rows * D * x_item
        transcendentals = rows
    else:
        # Columns outer, rows inner: each weight slice is fetched from HBM once
        # and x is the re-streamed operand (chosen when that is cheaper).
        grid = (col_tiles, row_tiles)
        x_spec = pl.BlockSpec((block_rows, D), lambda j, i: (i, 0))
        w_spec = pl.BlockSpec((D, block_cols), lambda j, i: (0, j))
        b_spec = pl.BlockSpec((1, block_cols), lambda j, i: (0, j))
        p_spec = pl.BlockSpec((1, D), lambda j, i: (0, 0))
        o_spec = pl.BlockSpec((block_rows, block_cols), lambda j, i: (i, j))
        weight_bytes = d_out * D * 2
        x_bytes = col_tiles * rows * D * x_item
        transcendentals = rows * col_tiles

    kernel = _ln_linear_hoisted_kernel if hoisted else _ln_linear_kernel
    scratch = ([pltpu.VMEM((block_rows, D), jnp.bfloat16)] if hoisted else [])

    cost = pl.CostEstimate(
        flops=2 * rows * D * d_out,
        transcendentals=transcendentals,
        bytes_accessed=x_bytes + weight_bytes + rows * d_out * out_item)

    need = _vmem_need_bytes(block_rows, block_cols, D, x_item, out_item, hoisted)
    vmem_limit = int(min(max(need + (4 << 20), 32 << 20), usable))

    out = pl.pallas_call(
        kernel,
        out_shape=jax.ShapeDtypeStruct((rows, d_out), out_dtype),
        grid_spec=pltpu.PrefetchScalarGridSpec(
            num_scalar_prefetch=0,
            grid=grid,
            in_specs=[x_spec, p_spec, p_spec, w_spec, b_spec],
            out_specs=o_spec,
            scratch_shapes=scratch),
        compiler_params=pltpu.CompilerParams(
            dimension_semantics=("parallel", "arbitrary"),
            vmem_limit_bytes=vmem_limit),
        cost_estimate=cost,
    )(x2, gamma2, beta2, w_t, b2)

    return out.reshape(B, S, d_out)


# ----------------------------- pure-JAX reference -----------------------------

def _fn_reference(x, gamma, beta, w, b):
    """fn = torch.nn.LayerNorm(D) followed by torch.nn.Linear(D, D), in f32."""
    mean = jnp.mean(x, axis=-1, keepdims=True)
    var = jnp.mean((x - mean) ** 2, axis=-1, keepdims=True)
    normed = (x - mean) / jnp.sqrt(var + LN_EPS) * gamma + beta
    return normed @ w.T + b


def _chunk_reference(x, gamma, beta, w, b, chunks, along_dim):
    """Literal Chunk.forward: split -> fn per piece -> concat."""
    if chunks == 1:
        return _fn_reference(x, gamma, beta, w, b)
    pieces = jnp.split(x, chunks, axis=along_dim)
    return jnp.concatenate(
        [_fn_reference(p, gamma, beta, w, b) for p in pieces], axis=along_dim)


if __name__ == "__main__":

    def run_case(name, key, B, S, D, chunks, **overrides):
        kx, kw, kb, kg, kbt = jax.random.split(key, 5)
        x = jax.random.normal(kx, (B, S, D), dtype=jnp.float32)
        gamma = 1.0 + 0.05 * jax.random.normal(kg, (D,), dtype=jnp.float32)
        beta = 0.05 * jax.random.normal(kbt, (D,), dtype=jnp.float32)
        w = jax.random.normal(kw, (D, D), dtype=jnp.float32) / jnp.sqrt(D)
        b = 0.1 * jax.random.normal(kb, (D,), dtype=jnp.float32)

        w_t = prepare_linear_weight(w)          # one-time transpose + bf16 cast
        out = chunk_forward(x, gamma, beta, w_t, b, chunks=chunks, along_dim=1,
                            **overrides)
        out = jax.block_until_ready(out)

        ref = _chunk_reference(x, gamma, beta, w, b, chunks, 1)
        assert out.shape == ref.shape
        max_err = float(jnp.max(jnp.abs(out - ref)))
        # bf16 MXU operands (f32 accumulate) => relaxed tolerance vs f32 ref.
        assert jnp.allclose(out, ref, atol=5e-2, rtol=5e-2), (
            f"{name}: mismatch vs reference (max abs err {max_err})")

    key = jax.random.PRNGKey(0)
    k1, k2, k3 = jax.random.split(key, 3)

    # 1) Default planner path: resident bf16 weight, single column tile,
    #    even number of row tiles (Chunk(chunks=2, fn, along_dim=1)).
    run_case("resident", k1, B=2, S=64, D=128, chunks=2)

    # 2) Forced column tiling, rows outer: exercises the hoisted-LN scratch path.
    run_case("row_outer_tiled", k2, B=2, S=64, D=256, chunks=2,
             block_rows=64, block_cols=128, layout="row_outer")

    # 3) Forced columns-outer layout: each weight slice fetched once, x re-streamed.
    run_case("col_outer_tiled", k3, B=2, S=64, D=256, chunks=2,
             block_rows=64, block_cols=128, layout="col_outer")

    print("KERNEL_OK")
</pallas_src>

<mosaic_0001>
module attributes {stable_mosaic.version = 11 : i64} {
  func.func @_ln_linear_kernel(%arg0: i32, %arg1: i32, %arg2: memref<64x128xf32, #tpu.memory_space<vmem>>, %arg3: memref<1x128xf32, #tpu.memory_space<vmem>>, %arg4: memref<1x128xf32, #tpu.memory_space<vmem>>, %arg5: memref<128x128xbf16, #tpu.memory_space<vmem>>, %arg6: memref<1x128xf32, #tpu.memory_space<vmem>>, %arg7: memref<64x128xf32, #tpu.memory_space<vmem>>) attributes {dimension_semantics = [#tpu.dimension_semantics<parallel>, #tpu.dimension_semantics<arbitrary>], iteration_bounds = array<i64: 2, 1>, scalar_prefetch = 0 : i64, scratch_operands = 0 : i64, tpu.core_type = #tpu.core_type<tc>, window_params = [{transform_indices = @transform_0, window_bounds = array<i64: 64, 128>}, {pipeline_mode = #tpu.pipeline_mode<synchronous>, transform_indices = @transform_1, window_bounds = array<i64: 1, 128>}, {pipeline_mode = #tpu.pipeline_mode<synchronous>, transform_indices = @transform_2, window_bounds = array<i64: 1, 128>}, {transform_indices = @transform_3, window_bounds = array<i64: 128, 128>}, {transform_indices = @transform_4, window_bounds = array<i64: 1, 128>}, {transform_indices = @transform_5, window_bounds = array<i64: 64, 128>}]} {
    %c0 = arith.constant 0 : index
    %c0_0 = arith.constant 0 : index
    %0 = vector.load %arg2[%c0, %c0_0] : memref<64x128xf32, #tpu.memory_space<vmem>>, vector<64x128xf32>
    %c0_1 = arith.constant 0 : index
    %c0_2 = arith.constant 0 : index
    %1 = vector.load %arg3[%c0_1, %c0_2] : memref<1x128xf32, #tpu.memory_space<vmem>>, vector<1x128xf32>
    %c0_3 = arith.constant 0 : index
    %c0_4 = arith.constant 0 : index
    %2 = vector.load %arg4[%c0_3, %c0_4] : memref<1x128xf32, #tpu.memory_space<vmem>>, vector<1x128xf32>
    %cst = arith.constant dense<0.000000e+00> : vector<64xf32>
    %3 = vector.multi_reduction <add>, %0, %cst [1] : vector<64x128xf32> to vector<64xf32>
    %4 = vector.shape_cast %3 : vector<64xf32> to vector<64x1xf32>
    %cst_5 = arith.constant 1.280000e+02 : f32
    %5 = vector.broadcast %cst_5 : f32 to vector<64x1xf32>
    %6 = arith.divf %4, %5 : vector<64x1xf32>
    %7 = vector.broadcast %6 : vector<64x1xf32> to vector<64x128xf32>
    %8 = arith.subf %0, %7 : vector<64x128xf32>
    %9 = arith.mulf %8, %8 : vector<64x128xf32>
    %cst_6 = arith.constant dense<0.000000e+00> : vector<64xf32>
    %10 = vector.multi_reduction <add>, %9, %cst_6 [1] : vector<64x128xf32> to vector<64xf32>
    %11 = vector.shape_cast %10 : vector<64xf32> to vector<64x1xf32>
    %cst_7 = arith.constant 1.280000e+02 : f32
    %12 = vector.broadcast %cst_7 : f32 to vector<64x1xf32>
    %13 = arith.divf %11, %12 : vector<64x1xf32>
    %cst_8 = arith.constant 9.99999974E-6 : f32
    %14 = vector.broadcast %cst_8 : f32 to vector<64x1xf32>
    %15 = arith.addf %13, %14 : vector<64x1xf32>
    %16 = math.rsqrt %15 : vector<64x1xf32>
    %17 = vector.broadcast %16 : vector<64x1xf32> to vector<64x128xf32>
    %18 = arith.mulf %8, %17 : vector<64x128xf32>
    %19 = vector.broadcast %1 : vector<1x128xf32> to vector<64x128xf32>
    %20 = arith.mulf %18, %19 : vector<64x128xf32>
    %21 = vector.broadcast %2 : vector<1x128xf32> to vector<64x128xf32>
    %22 = arith.addf %20, %21 : vector<64x128xf32>
    %23 = arith.truncf %22 : vector<64x128xf32> to vector<64x128xbf16>
    %c0_9 = arith.constant 0 : index
    %c0_10 = arith.constant 0 : index
    %24 = vector.load %arg5[%c0_9, %c0_10] : memref<128x128xbf16, #tpu.memory_space<vmem>>, vector<128x128xbf16>
    %cst_11 = arith.constant dense<0.000000e+00> : vector<64x128xf32>
    %25 = tpu.matmul %23, %24, %cst_11 {dimension_numbers = #tpu.dot_dimension_numbers<[1], [0], [0], [1], [0, 0, 1, 1], [], []>} : vector<64x128xbf16>, vector<128x128xbf16>, vector<64x128xf32> -> vector<64x128xf32>
    %c0_12 = arith.constant 0 : index
    %c0_13 = arith.constant 0 : index
    %26 = vector.load %arg6[%c0_12, %c0_13] : memref<1x128xf32, #tpu.memory_space<vmem>>, vector<1x128xf32>
    %27 = vector.broadcast %26 : vector<1x128xf32> to vector<64x128xf32>
    %28 = arith.addf %25, %27 : vector<64x128xf32>
    %c0_14 = arith.constant 0 : index
    %c0_15 = arith.constant 0 : index
    %29 = vector.load %arg7[%c0_14, %c0_15] : memref<64x128xf32, #tpu.memory_space<vmem>>, vector<64x128xf32>
    tpu.vector_store %arg7[%c0_14, %c0_15], %28 {strides = array<i32>} : memref<64x128xf32, #tpu.memory_space<vmem>>, vector<64x128xf32>,
    return
  }
  func.func @transform_0(%arg0: i32, %arg1: i32) -> (i32, i32) {
    %c0_i32 = arith.constant 0 : i32
    %c0_i32_0 = arith.constant 0 : i32
    return %arg0, %c0_i32 : i32, i32
  }
  func.func @transform_1(%arg0: i32, %arg1: i32) -> (i32, i32) {
    %c0_i32 = arith.constant 0 : i32
    %c0_i32_0 = arith.constant 0 : i32
    %c0_i32_1 = arith.constant 0 : i32
    return %c0_i32, %c0_i32_0 : i32, i32
  }
  func.func @transform_2(%arg0: i32, %arg1: i32) -> (i32, i32) {
    %c0_i32 = arith.constant 0 : i32
    %c0_i32_0 = arith.constant 0 : i32
    %c0_i32_1 = arith.constant 0 : i32
    return %c0_i32, %c0_i32_0 : i32, i32
  }
  func.func @transform_3(%arg0: i32, %arg1: i32) -> (i32, i32) {
    %c0_i32 = arith.constant 0 : i32
    %c0_i32_0 = arith.constant 0 : i32
    return %c0_i32, %arg1 : i32, i32
  }
  func.func @transform_4(%arg0: i32, %arg1: i32) -> (i32, i32) {
    %c0_i32 = arith.constant 0 : i32
    %c0_i32_0 = arith.constant 0 : i32
    return %c0_i32, %arg1 : i32, i32
  }
  func.func @transform_5(%arg0: i32, %arg1: i32) -> (i32, i32) {
    %c0_i32 = arith.constant 0 : i32
    return %arg0, %arg1 : i32, i32
  }
}

</mosaic_0001>

<bundles_post_ra>
// kernel: chunk_forward.1
= control target key start
LH: loop header
LB: loop body
LE: loop exit
PB: predicated region body
PF: predicated region fallthrough
CT: control target
= control target key end

     0   :  { %10 = vsyncpa [#allocation3], 0  ;;  %s1336_s0 = inlined_call_operand.hbm [shape: f32[128,128], index: 0, kind: input, shape index: {}]   ;;  %s1337_s1 = inlined_call_operand.vmem [shape: f32[1,128], index: 1, kind: input, shape index: {}]   ;;  %s1338_s2 = inlined_call_operand.vmem [shape: f32[1,128], index: 2, kind: input, shape index: {}]   ;;  %s1339_s3 = inlined_call_operand.hbm [shape: bf16[128,128], index: 3, kind: input, shape index: {}]   ;;  %s1340_s4 = inlined_call_operand.vmem [shape: f32[1,128], index: 4, kind: input, shape index: {}]   ;;  %s1341_s5 = inlined_call_operand.hbm [shape: f32[128,128], index: 5, kind: output, shape index: {}]  }
   0x1   :  { %12 = vsyncpa [#allocation3 + $0x1], 0 }
   0x2   :  { %13 = vsyncpa [#allocation6], 0 }
   0x3   :  { %14 = vsyncpa [#allocation4], 0 }
   0x4   :  { %16 = vsyncpa [#allocation4 + $0x1], 0  ;;  %s1064_s18 = smov 0   ;;  %s1066_s19 = smov 0  }
   0x5   :  { %s1068_s20 = smov 0   ;;  %s1070_s21 = smov 0  }
   0x6   :  { %s1072_s22 = smov 0   ;;  %s1074_s23 = smov 0  }
   0x7 LB: > { %s693_s24 = sadd.s32 4294967295, %s1023_s23   ;;  %s694_s25 = sadd.s32 4294967294, %s1023_s23   ;;  %s1023_s23 = sphi %s1074_s23, %s22_s23   ;;  %s1019_s22 = sphi %s1072_s22, %s1365_s22   ;;  %s1015_s21 = sphi %s1070_s21, %s1364_s21   ;;  %s1011_s20 = sphi %s1068_s20, %s1363_s20   ;;  %s1007_s19 = sphi %s1066_s19, %s1362_s19   ;;  %s1003_s18 = sphi %s1064_s18, %s1361_s18  }
   0x8   : > { %p54_p0 = scmp.ne.s32.totalorder %s1007_s19, %s1003_s18  ;;  %p1098_p1 = scmp.eq.s32.totalorder %s693_s24, 0 }
   0x9   : > { %p1102_p2 = scmp.eq.s32.totalorder %s693_s24, 1  ;;  %p180_p3 = scmp.eq.s32.totalorder %s694_s25, 1 }
   0xa   : > { %s1346_s26 = scalar_select %p1098_p1, 1, 0 }
   0xb   : > { %s1347_s27 = scalar_select %p1102_p2, 1, 0 }
   0xc   : > { %p1108_p4 = por %p1098_p1, %p54_p0  ;;  %p695_p5 = scmp.ge.s32.totalorder %s1023_s23, 1 }
   0xd   : > { %p1113_p6 = por %p180_p3, %p54_p0  ;;  %p187_p7 = scmp.lt.s32.totalorder %s1023_s23, 3 }
   0xe   : > { %s1348_s28 = scalar_select %p1108_p4, 1, 0 }
   0xf   : > { %s1349_s29 = scalar_select %p1113_p6, 1, 0 }
  0x10   : > { %p1118_p8 = pnand %p695_p5, %p187_p7  ;;  %s1025_s6 = smov [#allocation5]  }
  0x11   : > { %s207_s7 = sshll.u32 %s1025_s6, 4  ;;  %s34_s9 = sadd.s32 1, %s1019_s22  ;;  %s208_s7 = int_to_ptr.vmem [resolvable:$true] %s207_s7 }
  0x12   : > { %s1350_s30 = scalar_select %p1118_p8, 1, 0 }
  0x13   : > { %p784_p9 = pneg %p1118_p8  ;;  %s879_s12 = scalar_lea.hbm %s1339_s3, 1024 }
  0x14   : > { %p880_p12 = scmp.ne.s32.totalorder %s1339_s3, %s879_s12  ;;  %p886_p5 = scmp.lt.u32.totalorder %s879_s12, %s1339_s3 }
  0x15   : > { %p1127_p11 = pnand %p784_p9, %p1098_p1 }
  0x17   : > { %p881_p13 = pneg %p1127_p11 }
  0x19   : > { %p882_p0 = pnand %p881_p13, %p880_p12 }
  0x1b   : > { %p883_p3 = pneg %p882_p0 }
  0x1d   : > { %p888_p7 = pnand %p886_p5, %p883_p3 }
  0x1f   : > { %891 = shalt.err (!%p888_p7)
}
  0x20   : > { %s892_s17 = scalar_lea.vmem %s208_s7, 1024  ;;  %p900_p1 = scmp.lt.s32.totalorder %s208_s7, %s208_s7 }
  0x21   : > { %p893_p9 = scmp.ne.s32.totalorder %s208_s7, %s892_s17  ;;  %p901_p4 = scmp.lt.s32.totalorder %s892_s17, %s892_s17 }
  0x23   : > { %p895_p10 = pnand %p893_p9, %p881_p13  ;;  %p902_p8 = por %p901_p4, %p900_p1 }
  0x25   : > { %p896_p6 = pneg %p895_p10 }
  0x27   : > { %p903_p2 = pnand %p902_p8, %p896_p6 }
  0x29   : > { %906 = shalt.err (!%p903_p2)
}
  0x2a   : > { %s1026_s24 = smov 64   ;;  %s1027_s25 = smov 4  }
  0x2b   : > { %787 = dma.hbm_to_vmem [thread:$0]  (!%p1127_p11), %s1339_s3, 1024, %s208_s7, [#allocation6], %s1026_s24, %s1026_s24, %s1027_s25  }
  0x2c   : > { %p36_p1 = scmp.ge.s32.totalorder %s34_s9, 2  ;;  %s41_s11 = sadd.s32 1, %s1011_s20 }
  0x2d   : > { %p48_p2 = scmp.ne.s32.totalorder %s1011_s20, %s1007_s19  ;;  %p49_p4 = scmp.eq.s32.totalorder %s1023_s23, 0 }
  0x2e   : > { %s1367_s9 = smov (%p36_p1, %s34_s9), 0  ;;  %p1353_p8 = scmp.ne.s32.totalorder %s1347_s27, 0 }
  0x2f   : > { %p1154_p6 = por %p49_p4, %p48_p2  ;;  %s38_s8 = ssub.s32 %s1019_s22, %s1367_s9 }
  0x30   : > { %p1160_p10 = por %p1353_p8, %p48_p2  ;;  %p797_p12 = scmp.lt.s32.totalorder %s1023_s23, 2 }
  0x31   : > { %p39_p11 = scmp.eq.s32.totalorder %s38_s8, 0  ;;  %s227_s7 = sand.u32 1, %s1011_s20  }
  0x32   : > { %s699_s14 = sshll.u32 %s227_s7, 6  ;;  %s722_s16 = sshll.u32 %s1019_s22, 10 }
  0x33   : > { %s1169_s15 = scalar_select %p39_p11, %s1011_s20, %s41_s11  }
  0x34   : > { %s1175_s25 = scalar_lea.hbm %s1336_s0, %s722_s16  ;;  %s231_s27 = scalar_lea.vmem [#allocation2], %s699_s14 }
  0x35   : > { %s238_s6 = sshll.u32 %s231_s27, 4  ;;  %p1181_p13 = pnand %p797_p12, %p1154_p6  ;;  %s1177_s6 = int_to_ptr.vmem [resolvable:$true] %s238_s6 }
  0x36   : > { %s1185_s11 = scalar_lea.sflag [#allocation3], %s227_s7  ;;  %s907_s8 = scalar_lea.hbm %s1175_s25, 1024 }
  0x37   : > { %p908_p0 = scmp.ne.s32.totalorder %s1175_s25, %s907_s8  ;;  %p909_p3 = pneg %p1181_p13 }
  0x38   : > { %s912_s12 = scalar_lea.hbm %s1336_s0, 2048  ;;  %p913_p9 = scmp.lt.u32.totalorder %s1175_s25, %s1336_s0 }
  0x39   : > { %p910_p5 = pnand %p909_p3, %p908_p0  ;;  %p914_p1 = scmp.lt.u32.totalorder %s912_s12, %s907_s8 }
  0x3a   : > { %p916_p4 = scmp.lt.u32.totalorder %s907_s8, %s1175_s25 }
  0x3b   : > { %p911_p7 = pneg %p910_p5  ;;  %p915_p2 = por %p914_p1, %p913_p9 }
  0x3d   : > { %p917_p6 = por %p916_p4, %p915_p2 }
  0x3f   : > { %p918_p8 = pnand %p917_p6, %p911_p7 }
  0x41   : > { %921 = shalt.err (!%p918_p8)
}
  0x42   : > { %s922_s7 = scalar_lea.vmem %s1177_s6, 1024  ;;  %s1028_s27 = smov [#allocation2]  }
  0x43   : > { %p923_p12 = scmp.ne.s32.totalorder %s1177_s6, %s922_s7  ;;  %s927_s14 = sshll.u32 %s1028_s27, 4  ;;  %s928_s14 = int_to_ptr.vmem [resolvable:$false] %s927_s14 }
  0x44   : > { %s929_s16 = scalar_lea.vmem %s928_s14, 2048  ;;  %p930_p5 = scmp.lt.s32.totalorder %s1177_s6, %s928_s14 }
  0x45   : > { %p925_p11 = pnand %p923_p12, %p909_p3  ;;  %p931_p9 = scmp.lt.s32.totalorder %s929_s16, %s922_s7 }
  0x47   : > { %p926_p0 = pneg %p925_p11  ;;  %p932_p1 = por %p931_p9, %p930_p5 }
  0x49   : > { %p933_p2 = pnand %p932_p1, %p926_p0 }
  0x4b   : > { %936 = shalt.err (!%p933_p2)
}
  0x4c   : > { %s1029_s8 = smov 128   ;;  %s1030_s12 = smov 8  }
  0x4d   : > { %791 = dma.hbm_to_vmem [thread:$0]  (!%p1181_p13), %s1175_s25, 1024, %s1177_s6, %s1185_s11, %s1029_s8, %s1029_s8, %s1030_s12  }
  0x4e   : > { %p1356_p3 = scmp.ne.s32.totalorder %s1350_s30, 0 }
  0x4f   : > { %s1216_s17 = sand.u32 (!%p1356_p3), 1, %s1007_s19   ;;  %p1357_p7 = scmp.ne.s32.totalorder (!%p1356_p3), %s1348_s28, 0 }
  0x50   : > { %250 = sbr.rel (%p1356_p3) target bundleno = 653 (0x28d), region = 40  ;;  %s703_s24 = sshll.u32 (!%p1356_p3), %s1216_s17, 6 }
  0x51   : > { %s253_s7 = scalar_lea.sflag (!%p1356_p3), [#allocation3], %s1216_s17  ;;  %s256_s27 = scalar_lea.vmem (!%p1356_p3), [#allocation2], %s703_s24 }
  0x57   : > { %990 = dma.done.wait (%p1357_p7), %s253_s7, 1024  }
  0x58   : > { %992 = vsyncadd (%p1357_p7), %s253_s7, 4294966272  ;;  %p1358_p13 = scmp.ne.s32.totalorder %s1346_s26, 0 }
  0x5a   : > { %994 = dma.done.wait (%p1358_p13), [#allocation6], 1024  }
  0x5b   : > { %996 = vsyncadd (%p1358_p13), [#allocation6], 4294966272  ;;  %v296_v0 = vld [vmem:[%s256_s27] sm:$0xff]  ;;  %v297_v2 = vld [vmem:[%s256_s27 + $0x8] sm:$0xff]  ;;  %s289_s11 = scalar_lea.vmem [#allocation7], %s703_s24  ;;  %s723_s16 = sshll.u32 %s1015_s21, 10 }
  0x5c   : > { %v300_v1 = vld [vmem:[%s256_s27 + $0x20] sm:$0xff]  ;;  %306 = vadd.xlane.f32.xlu0 %v296_v0  ;;  %v301_v3 = vld [vmem:[%s256_s27 + $0x28] sm:$0xff]  ;;  %v298_v4 = vld [vmem:[%s256_s27 + $0x10] sm:$0xff]  ;;  %s586_s14 = sshll.u32 %s289_s11, 4  ;;  %s1287_s21 = scalar_lea.hbm %s1341_s5, %s723_s16  ;;  %s1282_s14 = int_to_ptr.vmem [resolvable:$true] %s586_s14 }
  0x5d   : > { %314 = vadd.xlane.f32.xlu1 %v300_v1  ;;  %v299_v5 = vld [vmem:[%s256_s27 + $0x18] sm:$0xff]  ;;  %v302_v6 = vld [vmem:[%s256_s27 + $0x30] sm:$0xff]  ;;  %v855_v40 = vld [vmem:[#allocation5] sm:$0xff]   ;;  %s572_s24 = scalar_lea.sflag [#allocation4], %s1216_s17  ;;  %s937_s7 = scalar_lea.vmem %s1282_s14, 1024 }
  0x5e   : > { %v303_v7 = vld [vmem:[%s256_s27 + $0x38] sm:$0xff]  ;;  %736 = vmatprep.subr.bf16.mxu0 %v855_v40  ;;  %760 = vmatprep.subr.bf16.mxu1 %v855_v40  ;;  %v856_v41 = vld [vmem:[#allocation5 + $0x8] sm:$0xff]   ;;  %v857_v42 = vld [vmem:[#allocation5 + $0x10] sm:$0xff]   ;;  %p938_p4 = scmp.ne.s32.totalorder %s1282_s14, %s937_s7  ;;  %s1031_s27 = smov [#allocation7]  }
  0x5f   : > { %737 = vmatpush3.bf16.msra.mxu0 %v855_v40  ;;  %768 = vmatpush3.bf16.msra.mxu1 %v855_v40  ;;  %v858_v43 = vld [vmem:[#allocation5 + $0x18] sm:$0xff]   ;;  %v859_v44 = vld [vmem:[#allocation5 + $0x20] sm:$0xff]   ;;  %v860_v45 = vld [vmem:[#allocation5 + $0x28] sm:$0xff]   ;;  %s941_s26 = sshll.u32 %s1031_s27, 4  ;;  %s942_s26 = int_to_ptr.vmem [resolvable:$false] %s941_s26 }
  0x60   : > { %308 = vadd.xlane.f32.xlu0 %v297_v2  ;;  %738 = vmatprep.subr.bf16.mxu0 %v856_v41  ;;  %v861_v46 = vld [vmem:[#allocation5 + $0x30] sm:$0xff]   ;;  %v862_v47 = vld [vmem:[#allocation5 + $0x38] sm:$0xff]   ;;  %p939_p6 = pnand %p938_p4, %p1160_p10  ;;  %s943_s28 = scalar_lea.vmem %s942_s26, 2048 }
  0x61   : > { %316 = vadd.xlane.f32.xlu1 %v301_v3  ;;  %761 = vmatprep.subr.bf16.mxu1 %v856_v41  ;;  %p944_p12 = scmp.lt.s32.totalorder %s1282_s14, %s942_s26  ;;  %p945_p11 = scmp.lt.s32.totalorder %s943_s28, %s937_s7 }
  0x62   : > { %p940_p8 = pneg %p939_p6 }
  0x63   : > { %739 = vmatpush3.bf16.msra.mxu0 %v856_v41  ;;  %769 = vmatpush3.bf16.msra.mxu1 %v856_v41  ;;  %p946_p0 = por %p945_p11, %p944_p12 }
  0x64   : > { %310 = vadd.xlane.f32.xlu0 %v298_v4  ;;  %740 = vmatprep.subr.bf16.mxu0 %v857_v42 }
  0x65   : > { %312 = vadd.xlane.f32.xlu1 %v299_v5  ;;  %762 = vmatprep.subr.bf16.mxu1 %v857_v42  ;;  %p947_p5 = pnand %p946_p0, %p940_p8 }
  0x67   : > { %741 = vmatpush3.bf16.msra.mxu0 %v857_v42  ;;  %770 = vmatpush3.bf16.msra.mxu1 %v857_v42 }
  0x68   : > { %318 = vadd.xlane.f32.xlu0 %v302_v6  ;;  %742 = vmatprep.subr.bf16.mxu0 %v858_v43 }
  0x69   : > { %320 = vadd.xlane.f32.xlu1 %v303_v7  ;;  %763 = vmatprep.subr.bf16.mxu1 %v858_v43 }
  0x6b   : > { %743 = vmatpush3.bf16.msra.mxu0 %v858_v43  ;;  %771 = vmatpush3.bf16.msra.mxu1 %v858_v43 }
  0x6c   : > { %744 = vmatprep.subr.bf16.mxu0 %v859_v44  ;;  %764 = vmatprep.subr.bf16.mxu1 %v859_v44 }
  0x6f   : > { %745 = vmatpush3.bf16.msra.mxu0 %v859_v44  ;;  %772 = vmatpush3.bf16.msra.mxu1 %v859_v44 }
  0x70   : > { %746 = vmatprep.subr.bf16.mxu0 %v860_v45  ;;  %765 = vmatprep.subr.bf16.mxu1 %v860_v45 }
  0x73   : > { %747 = vmatpush3.bf16.msra.mxu0 %v860_v45  ;;  %773 = vmatpush3.bf16.msra.mxu1 %v860_v45 }
  0x74   : > { %748 = vmatprep.subr.bf16.mxu0 %v861_v46  ;;  %766 = vmatprep.subr.bf16.mxu1 %v861_v46 }
  0x77   : > { %749 = vmatpush3.bf16.msra.mxu0 %v861_v46  ;;  %774 = vmatpush3.bf16.msra.mxu1 %v861_v46 }
  0x78   : > { %750 = vmatprep.subr.bf16.mxu0 %v862_v47  ;;  %767 = vmatprep.subr.bf16.mxu1 %v862_v47 }
  0x7b   : > { %751 = vmatpush3.bf16.msra.mxu0 %v862_v47  ;;  %775 = vmatpush3.bf16.msra.mxu1 %v862_v47 }
  0xe9   : > { %v307_v8 = vpop.xlane.xlu0 %306 }
  0xea   : > { %v315_v9 = vpop.xlane.xlu1 %314  ;;  %v323_v10 = vmul.f32 0.0078125, %v307_v8 }
  0xeb   : > { %v327_v11 = vmul.f32 0.0078125, %v315_v9  ;;  %v706_v9 = vld [vmem:[%s1337_s1] ss:$0 sm:$0xff] }
  0xec   : > { %v1230_v12 = vsub.f32 %v296_v0, %v323_v10 }
  0xed   : > { %v1232_v13 = vsub.f32 %v300_v1, %v327_v11  ;;  %v309_v14 = vpop.xlane.xlu0 %308 }
  0xee   : > { %v317_v15 = vpop.xlane.xlu1 %316  ;;  %v324_v16 = vmul.f32 0.0078125, %v309_v14  ;;  %v339_v17 = vmul.f32 %v1230_v12, %v1230_v12 }
  0xef   : > { %v328_v18 = vmul.f32 0.0078125, %v317_v15  ;;  %v343_v21 = vmul.f32 %v1232_v13, %v1232_v13 }
  0xf0   : > { %v1236_v19 = vsub.f32 %v297_v2, %v324_v16  ;;  %347 = vadd.xlane.f32.xlu0 %v339_v17  ;;  %v707_v17 = vld [vmem:[%s1338_s2] ss:$0 sm:$0xff] }
  0xf1   : > { %v1238_v20 = vsub.f32 %v301_v3, %v328_v18  ;;  %v311_v22 = vpop.xlane.xlu0 %310 }
  0xf2   : > { %v313_v23 = vpop.xlane.xlu1 %312  ;;  %v325_v24 = vmul.f32 0.0078125, %v311_v22  ;;  %v340_v25 = vmul.f32 %v1236_v19, %v1236_v19 }
  0xf3   : > { %v326_v26 = vmul.f32 0.0078125, %v313_v23  ;;  %v344_v29 = vmul.f32 %v1238_v20, %v1238_v20 }
  0xf4   : > { %v1244_v27 = vsub.f32 %v298_v4, %v325_v24  ;;  %355 = vadd.xlane.f32.xlu0 %v343_v21  ;;  %349 = vadd.xlane.f32.xlu1 %v340_v25 }
  0xf5   : > { %v1246_v28 = vsub.f32 %v299_v5, %v326_v26  ;;  %v319_v30 = vpop.xlane.xlu0 %318 }
  0xf6   : > { %v321_v31 = vpop.xlane.xlu1 %320  ;;  %v329_v32 = vmul.f32 0.0078125, %v319_v30  ;;  %v341_v33 = vmul.f32 %v1244_v27, %v1244_v27 }
  0xf7   : > { %v330_v34 = vmul.f32 0.0078125, %v321_v31  ;;  %v342_v37 = vmul.f32 %v1246_v28, %v1246_v28 }
  0xf8   : > { %v1252_v35 = vsub.f32 %v302_v6, %v329_v32  ;;  %357 = vadd.xlane.f32.xlu1 %v344_v29  ;;  %351 = vadd.xlane.f32.xlu0 %v341_v33 }
  0xf9   : > { %v1254_v36 = vsub.f32 %v303_v7, %v330_v34 }
  0xfa   : > { %v345_v38 = vmul.f32 %v1252_v35, %v1252_v35 }
  0xfb   : > { %v346_v39 = vmul.f32 %v1254_v36, %v1254_v36 }
  0xfc   : > { %353 = vadd.xlane.f32.xlu1 %v342_v37  ;;  %359 = vadd.xlane.f32.xlu0 %v345_v38 }
 0x100   : > { %361 = vadd.xlane.f32.xlu1 %v346_v39 }
 0x17d   : > { %v348_v48 = vpop.xlane.xlu0 %347 }
 0x17e   : > { %v363_v49 = vmul.f32 0.0078125, %v348_v48 }
 0x180   : > { %v371_v50 = vadd.f32 1e-05, %v363_v49 }
 0x181   : > { %v350_v51 = vpop.xlane.xlu1 %349  ;;  %v356_v52 = vpop.xlane.xlu0 %355 }
 0x182   : > { %863 = vrsqrt.f32 %v371_v50  ;;  %v364_v53 = vmul.f32 0.0078125, %v350_v51  ;;  %v367_v54 = vmul.f32 0.0078125, %v356_v52 }
 0x184   : > { %v372_v55 = vadd.f32 1e-05, %v364_v53  ;;  %v375_v56 = vadd.f32 1e-05, %v367_v54 }
 0x185   : > { %v358_v57 = vpop.xlane.xlu1 %357  ;;  %v352_v58 = vpop.xlane.xlu0 %351 }
 0x186   : > { %865 = vrsqrt.f32 %v372_v55  ;;  %v368_v59 = vmul.f32 0.0078125, %v358_v57  ;;  %v365_v60 = vmul.f32 0.0078125, %v352_v58 }
 0x187   : > { %867 = vrsqrt.f32 %v375_v56 }
 0x188   : > { %v376_v61 = vadd.f32 1e-05, %v368_v59  ;;  %v373_v62 = vadd.f32 1e-05, %v365_v60 }
 0x189   : > { %v354_v63 = vpop.xlane.xlu1 %353  ;;  %v360_v0 = vpop.xlane.xlu0 %359 }
 0x18a   : > { %869 = vrsqrt.f32 %v376_v61  ;;  %v366_v1 = vmul.f32 0.0078125, %v354_v63  ;;  %v369_v2 = vmul.f32 0.0078125, %v360_v0 }
 0x18b   : > { %871 = vrsqrt.f32 %v373_v62 }
 0x18c   : > { %v864_v3 = vpop.eup %863  ;;  %v374_v4 = vadd.f32 1e-05, %v366_v1  ;;  %v377_v5 = vadd.f32 1e-05, %v369_v2 }
 0x18d   : > { %v362_v6 = vpop.xlane.xlu1 %361  ;;  %v387_v7 = vmul.f32 %v864_v3, %v1230_v12 }
 0x18e   : > { %873 = vrsqrt.f32 %v374_v4  ;;  %v370_v8 = vmul.f32 0.0078125, %v362_v6 }
 0x18f   : > { %875 = vrsqrt.f32 %v377_v5  ;;  %v401_v16 = vmul.f32 %v706_v9, %v387_v7 }
 0x190   : > { %v866_v10 = vpop.eup %865  ;;  %v378_v11 = vadd.f32 1e-05, %v370_v8 }
 0x191   : > { %v868_v14 = vpop.eup %867  ;;  %v388_v15 = vmul.f32 %v866_v10, %v1236_v19  ;;  %v415_v23 = vadd.f32 %v707_v17, %v401_v16 }
 0x192   : > { %877 = vrsqrt.f32 %v378_v11  ;;  %v391_v12 = vmul.f32 %v868_v14, %v1232_v13 }
 0x193   : > { %v402_v18 = vmul.f32 %v706_v9, %v388_v15 }
 0x194   : > { %v870_v21 = vpop.eup %869  ;;  %v405_v26 = vmul.f32 %v706_v9, %v391_v12 }
 0x195   : > { %v872_v22 = vpop.eup %871  ;;  %v416_v24 = vadd.f32 %v707_v17, %v402_v18  ;;  %v392_v25 = vmul.f32 %v870_v21, %v1238_v20 }
 0x196   : > { %v389_v29 = vmul.f32 %v872_v22, %v1244_v27  ;;  %v419_v33 = vadd.f32 %v707_v17, %v405_v26 }
 0x197   : > { %v423_v30 = vpack.c.bf16 %v416_v24, %v415_v23  ;;  %v406_v19 = vmul.f32 %v706_v9, %v392_v25 }
 0x198   : > { %v874_v31 = vpop.eup %873  ;;  %v403_v13 = vmul.f32 %v706_v9, %v389_v29 }
 0x199   : > { %v876_v32 = vpop.eup %875  ;;  %752 = vmatprep.mubr.bf16.mxu0 %v423_v30  ;;  %v420_v34 = vadd.f32 %v707_v17, %v406_v19  ;;  %v390_v37 = vmul.f32 %v874_v31, %v1246_v28  ;;  %v708_v28 = vld [vmem:[%s1340_s4] ss:$0 sm:$0xff] }
 0x19a   : > { %v393_v38 = vmul.f32 %v876_v32, %v1252_v35  ;;  %v417_v20 = vadd.f32 %v707_v17, %v403_v13 }
 0x19b   : > { %v425_v39 = vpack.c.bf16 %v420_v34, %v419_v33  ;;  %v404_v40 = vmul.f32 %v706_v9, %v390_v37 }
 0x19c   : > { %v878_v41 = vpop.eup %877  ;;  %v407_v43 = vmul.f32 %v706_v9, %v393_v38 }
 0x19d   : > { %756 = vmatprep.mubr.bf16.mxu1 %v425_v39  ;;  %v418_v42 = vadd.f32 %v707_v17, %v404_v40  ;;  %v394_v27 = vmul.f32 %v878_v41, %v1254_v36 }
 0x19e   : > { %v421_v46 = vadd.f32 %v707_v17, %v407_v43 }
 0x19f   : > { %v424_v44 = vpack.c.bf16 %v418_v42, %v417_v20  ;;  %v408_v45 = vmul.f32 %v706_v9, %v394_v27 }
 0x1a1   : > { %753 = vmatmul.mubr.bf16.vlgmr.msra.gmra.mrb[0].mxu0 %v424_v44  ;;  %v422_v47 = vadd.f32 %v707_v17, %v408_v45 }
 0x1a3   : > { %v426_v48 = vpack.c.bf16 %v422_v47, %v421_v46 }
 0x1a5   : > { %757 = vmatmul.mubr.bf16.vlgmr.msra.gmra.mrb[0].mxu1 %v426_v48 }
 0x274   : > { %v754_v35 = vpop.f32.mrb[0].mxu0 }
 0x275   : > { %v541_v49 = vadd.f32 %v754_v35, %v708_v28  ;;  %v532_v50 = vpop.f32.mrb[1].mxu0 }
 0x276   : > { %v533_v51 = vadd.f32 %v708_v28, %v532_v50  ;;  %v755_v52 = vpop.f32.mrb[2].mxu0 }
 0x277   : > { %565 = vst [vmem:[%s289_s11 + $0x10] sm:$0xff] %v541_v49  ;;  %v544_v36 = vadd.f32 %v755_v52, %v708_v28  ;;  %v535_v53 = vpop.f32.mrb[3].mxu0 }
 0x278   : > { %563 = vst [vmem:[%s289_s11] sm:$0xff] %v533_v51  ;;  %v536_v54 = vadd.f32 %v708_v28, %v535_v53  ;;  %v758_v55 = vpop.f32.mrb[0].mxu1 }
 0x279   : > { %566 = vst [vmem:[%s289_s11 + $0x18] sm:$0xff] %v544_v36  ;;  %v557_v56 = vadd.f32 %v758_v55, %v708_v28  ;;  %v548_v57 = vpop.f32.mrb[1].mxu1 }
 0x27a   : > { %564 = vst [vmem:[%s289_s11 + $0x8] sm:$0xff] %v536_v54  ;;  %v549_v58 = vadd.f32 %v708_v28, %v548_v57  ;;  %v759_v59 = vpop.f32.mrb[2].mxu1 }
 0x27b   : > { %569 = vst [vmem:[%s289_s11 + $0x30] sm:$0xff] %v557_v56  ;;  %v560_v60 = vadd.f32 %v759_v59, %v708_v28  ;;  %v551_v61 = vpop.f32.mrb[3].mxu1 }
 0x27c   : > { %567 = vst [vmem:[%s289_s11 + $0x20] sm:$0xff] %v549_v58  ;;  %v552_v62 = vadd.f32 %v708_v28, %v551_v61 }
 0x27d   : > { %570 = vst [vmem:[%s289_s11 + $0x38] sm:$0xff] %v560_v60 }
 0x27e   : > { %568 = vst [vmem:[%s289_s11 + $0x28] sm:$0xff] %v552_v62 }
 0x27f   : > { %950 = shalt.err (!%p947_p5)
}
 0x280   : > { %s951_s30 = scalar_lea.hbm %s1287_s21, 1024  ;;  %s955_s10 = scalar_lea.hbm %s1341_s5, 2048 }
 0x281   : > { %p952_p9 = scmp.ne.s32.totalorder %s1287_s21, %s951_s30  ;;  %p956_p3 = scmp.lt.u32.totalorder %s1287_s21, %s1341_s5 }
 0x282   : > { %p957_p7 = scmp.lt.u32.totalorder %s955_s10, %s951_s30  ;;  %p959_p4 = scmp.lt.u32.totalorder %s951_s30, %s1287_s21 }
 0x283   : > { %p953_p1 = pnand %p952_p9, %p1160_p10 }
 0x284   : > { %p958_p13 = por %p957_p7, %p956_p3 }
 0x285   : > { %p954_p2 = pneg %p953_p1 }
 0x286   : > { %p960_p6 = por %p959_p4, %p958_p13 }
 0x288   : > { %p961_p8 = pnand %p960_p6, %p954_p2 }
 0x28a   : > { %964 = shalt.err (!%p961_p8)
}
 0x28b   : > { %s1032_s8 = smov 128   ;;  %s1033_s12 = smov 8  }
 0x28c   : > { %782 = dma.vmem_to_hbm [thread:$0]  (%p1160_p10), %s1282_s14, 1024, %s1287_s21, %s572_s24, %s1032_s8, %s1032_s8, %s1033_s12  }
 0x28d PF: > { %s601_s7 = sand.u32 1, %s1003_s18   ;;  %p1359_p12 = scmp.ne.s32.totalorder %s1349_s29, 0 }
 0x28e   : > { %p1360_p11 = scmp.ge.s32.totalorder %s1023_s23, 2  ;;  %s602_s27 = scalar_lea.sflag [#allocation4], %s601_s7 }
 0x290   : > { %p793_p0 = pnand %p1360_p11, %p1359_p12 }
 0x292   : > { %998 = dma.done.wait (!%p793_p0), %s602_s27, 1024  }
 0x293   : > { %1000 = vsyncadd (!%p793_p0), %s602_s27, 4294966272  ;;  %s22_s23 = sadd.s32 1, %s1023_s23   ;;  %s1361_s18 = smov %s1007_s19 }
 0x294   : > { %p19_p5 = scmp.ge.s32.totalorder %s22_s23, 4   ;;  %s1362_s19 = smov %s1011_s20 }
 0x295   : > { %s1363_s20 = smov %s1169_s15  ;;  %s1364_s21 = smov %s1019_s22 }
 0x296   : > { %s1365_s22 = smov %s1367_s9  ;;  %21 = sbr.rel (!%p19_p5) target bundleno = 7 (0x7), region = 93 }
 0x29d   :  { %607 = vsyncpa [#allocation3], 1 }
 0x29e   :  { %609 = vsyncpa [#allocation3 + $0x1], 1 }
 0x29f   :  { %610 = vsyncpa [#allocation6], 1 }
 0x2a0   :  { %611 = vsyncpa [#allocation4], 1 }
 0x2a1   :  { %613 = vsyncpa [#allocation4 + $0x1], 1 }

</bundles_post_ra>
